<compile_context>
chip_gen: v6e
topology: v6e:2x2x1
jax: 0.10.0
libtpu: 0.0.40
codegen_flags: <defaults>
</compile_context>

<pallas_src>
import jax
import jax.numpy as jnp
from jax import lax
from jax.experimental import pallas as pl
from jax.experimental.pallas import tpu as pltpu


def _mha_kernel(x_ref, wqkv_ref, bqkv_ref, o_ref):
    bt, S, D = x_ref.shape
    x = x_ref[...]                                        # (bt, S, D) f32

    # ---- Fused QKV projection: one wide MXU matmul over all bt*S rows ----
    x2d = x.reshape(bt * S, D)                            # merge leading dims
    qkv = (jnp.dot(x2d, wqkv_ref[...], preferred_element_type=jnp.float32)
           + bqkv_ref[...])                               # (bt*S, 3D)
    # NOTE: at D=32 these lane-offset slices are hidden under step overhead;
    # if D ever reaches >=128, pad each segment to a 128-lane boundary instead.
    q = qkv[:, 0 * D:1 * D].reshape(bt, S, D)
    k = qkv[:, 1 * D:2 * D].reshape(bt, S, D)
    v = qkv[:, 2 * D:3 * D].reshape(bt, S, D)

    # ---- score = (Q @ K^T) @ V, batched, no materialized transpose ----
    # (If B grows large, pack ~floor(128/S) batches per MXU push with a
    #  block-diagonal mask; irrelevant at these shapes.)
    score = lax.dot_general(                              # (bt, S, S)
        q, k, dimension_numbers=(((2,), (2,)), ((0,), (0,))),
        preferred_element_type=jnp.float32)
    score = lax.dot_general(                              # (bt, S, D)
        score, v, dimension_numbers=(((2,), (1,)), ((0,), (0,))),
        preferred_element_type=jnp.float32)

    # ---- softmax over dim=2 (feature dim), matching the PyTorch module ----
    m = jnp.max(score, axis=-1, keepdims=True)
    e = jnp.exp(score - m)
    attn = e / jnp.sum(e, axis=-1, keepdims=True)         # exact division

    o_ref[...] = (attn + x).astype(o_ref.dtype)


def fuse_qkv_params(wq, bq, wk, bk, wv, bv):
    """One-time parameter prep (do NOT call per forward pass).

    wq/wk/wv: (D, D) in PyTorch (out, in) layout; bq/bk/bv: (D,).
    Returns (w_qkv (D, 3D) in x@W layout, b_qkv (1, 3D)).
    """
    w_qkv = jnp.concatenate([wq.T, wk.T, wv.T], axis=1)
    b_qkv = jnp.concatenate([bq, bk, bv]).reshape(1, -1)
    return w_qkv, b_qkv


def _pick_block_b(B, S, D, max_vmem_bytes=16 << 20):
    """Largest batch tile that (a) divides B, (b) leaves >=2 grid steps when
    B > 1 (both v7x TensorCores get work), (c) fits a conservative per-step
    VMEM budget valid on v5e/v6e (128 MiB) and v7x (64 MiB physical)."""
    def footprint(bt):
        xs = bt * S * D * 4
        return (2 * 2 * xs                     # double-buffered x + out blocks
                + D * 3 * D * 4 + 3 * D * 4    # fused weight + bias
                + 3 * xs                       # qkv live temp
                + 2 * bt * S * S * 4           # score + exp
                + xs)                          # attn
    target = B if B == 1 else max(1, B // 2)
    bt = target
    while bt > 1 and (B % bt != 0 or footprint(bt) > max_vmem_bytes):
        bt -= 1
    return max(bt, 1)


def multi_head_attention(x, w_qkv, b_qkv, *, block_b=None):
    """x: (B, S, D) float32. w_qkv: (D, 3D), b_qkv: (1, 3D) from fuse_qkv_params."""
    B, S, D = x.shape
    if block_b is None:
        block_b = _pick_block_b(B, S, D)
    assert B % block_b == 0, "block_b must divide B"

    x_spec = pl.BlockSpec((block_b, S, D), lambda i: (i, 0, 0))
    w_spec = pl.BlockSpec((D, 3 * D), lambda i: (0, 0))
    b_spec = pl.BlockSpec((1, 3 * D), lambda i: (0, 0))

    flops = 2 * B * S * D * (3 * D) + 2 * 2 * B * S * S * D
    bytes_accessed = 4 * (2 * B * S * D + D * 3 * D + 3 * D)

    return pl.pallas_call(
        _mha_kernel,
        out_shape=jax.ShapeDtypeStruct((B, S, D), x.dtype),
        grid=(B // block_b,),
        in_specs=[x_spec, w_spec, b_spec],
        out_specs=x_spec,
        input_output_aliases={0: 0},          # out reuses x's buffer when donatable
        compiler_params=pltpu.CompilerParams(
            dimension_semantics=("parallel",)),  # shards batch tiles across TCs
        cost_estimate=pl.CostEstimate(
            flops=flops, transcendentals=B * S * D,
            bytes_accessed=bytes_accessed),
    )(x, w_qkv, b_qkv)


def _reference(x, wq, bq, wk, bk, wv, bv):
    q = jnp.einsum("bsd,ed->bse", x, wq) + bq
    k = jnp.einsum("bsd,ed->bse", x, wk) + bk
    v = jnp.einsum("bsd,ed->bse", x, wv) + bv
    score = jnp.einsum("bse,bte->bst", q, k)
    score = jnp.einsum("bst,btd->bsd", score, v)
    attn = jax.nn.softmax(score, axis=2)
    return attn + x


if __name__ == "__main__":
    B, S, D = 2, 8, 32  # batch, sequence length, out_channel

    key = jax.random.PRNGKey(0)
    kx, kq, kk, kv, kbq, kbk, kbv = jax.random.split(key, 7)

    x = jax.random.normal(kx, (B, S, D), dtype=jnp.float32)

    # Deterministic Linear params (PyTorch layout: weight (out, in), bias (out,))
    bound = 1.0 / jnp.sqrt(D)
    wq = jax.random.uniform(kq, (D, D), jnp.float32, -bound, bound)
    wk = jax.random.uniform(kk, (D, D), jnp.float32, -bound, bound)
    wv = jax.random.uniform(kv, (D, D), jnp.float32, -bound, bound)
    bq = jax.random.uniform(kbq, (D,), jnp.float32, -bound, bound)
    bk = jax.random.uniform(kbk, (D,), jnp.float32, -bound, bound)
    bv = jax.random.uniform(kbv, (D,), jnp.float32, -bound, bound)

    # Reference first (the kernel output may alias/donate x's buffer).
    ref = _reference(x, wq, bq, wk, bk, wv, bv)

    # One-time parameter prep (hoisted out of the per-call path).
    w_qkv, b_qkv = fuse_qkv_params(wq, bq, wk, bk, wv, bv)
    w_qkv, b_qkv = jax.block_until_ready((w_qkv, b_qkv))

    out = multi_head_attention(x, w_qkv, b_qkv)
    out = jax.block_until_ready(out)

    assert out.shape == (B, S, D)
    assert jnp.allclose(out, ref, atol=1e-4, rtol=1e-4), "mismatch vs reference"

    print("KERNEL_OK")
</pallas_src>

<mosaic_0001>
module attributes {stable_mosaic.version = 11 : i64} {
  func.func @_mha_kernel(%arg0: i32, %arg1: memref<1x8x32xf32, #tpu.memory_space<vmem>>, %arg2: memref<32x96xf32, #tpu.memory_space<vmem>>, %arg3: memref<1x96xf32, #tpu.memory_space<vmem>>, %arg4: memref<1x8x32xf32, #tpu.memory_space<vmem>>) attributes {dimension_semantics = [#tpu.dimension_semantics<parallel>], iteration_bounds = array<i64: 2>, scalar_prefetch = 0 : i64, scratch_operands = 0 : i64, tpu.core_type = #tpu.core_type<tc>, window_params = [{transform_indices = @transform_0, window_bounds = array<i64: 1, 8, 32>}, {pipeline_mode = #tpu.pipeline_mode<synchronous>, transform_indices = @transform_1, window_bounds = array<i64: 32, 96>}, {pipeline_mode = #tpu.pipeline_mode<synchronous>, transform_indices = @transform_2, window_bounds = array<i64: 1, 96>}, {transform_indices = @transform_3, window_bounds = array<i64: 1, 8, 32>}]} {
    %c0 = arith.constant 0 : index
    %c0_0 = arith.constant 0 : index
    %c0_1 = arith.constant 0 : index
    %0 = vector.load %arg1[%c0, %c0_0, %c0_1] : memref<1x8x32xf32, #tpu.memory_space<vmem>>, vector<1x8x32xf32>
    %1 = vector.shape_cast %0 : vector<1x8x32xf32> to vector<8x32xf32>
    %c0_2 = arith.constant 0 : index
    %c0_3 = arith.constant 0 : index
    %2 = vector.load %arg2[%c0_2, %c0_3] : memref<32x96xf32, #tpu.memory_space<vmem>>, vector<32x96xf32>
    %cst = arith.constant dense<0.000000e+00> : vector<8x96xf32>
    %3 = tpu.matmul %1, %2, %cst {dimension_numbers = #tpu.dot_dimension_numbers<[1], [0], [0], [1], [0, 0, 1, 1], [], []>} : vector<8x32xf32>, vector<32x96xf32>, vector<8x96xf32> -> vector<8x96xf32>
    %c0_4 = arith.constant 0 : index
    %c0_5 = arith.constant 0 : index
    %4 = vector.load %arg3[%c0_4, %c0_5] : memref<1x96xf32, #tpu.memory_space<vmem>>, vector<1x96xf32>
    %5 = vector.broadcast %4 : vector<1x96xf32> to vector<8x96xf32>
    %6 = arith.addf %3, %5 : vector<8x96xf32>
    %7 = vector.extract_strided_slice %6 {offsets = [0, 0], sizes = [8, 32], strides = [1, 1]} : vector<8x96xf32> to vector<8x32xf32>
    %8 = vector.shape_cast %7 : vector<8x32xf32> to vector<1x8x32xf32>
    %9 = vector.extract_strided_slice %6 {offsets = [0, 32], sizes = [8, 32], strides = [1, 1]} : vector<8x96xf32> to vector<8x32xf32>
    %10 = vector.shape_cast %9 : vector<8x32xf32> to vector<1x8x32xf32>
    %11 = vector.extract_strided_slice %6 {offsets = [0, 64], sizes = [8, 32], strides = [1, 1]} : vector<8x96xf32> to vector<8x32xf32>
    %12 = vector.shape_cast %11 : vector<8x32xf32> to vector<1x8x32xf32>
    %cst_6 = arith.constant dense<0.000000e+00> : vector<1x8x8xf32>
    %13 = tpu.matmul %8, %10, %cst_6 {dimension_numbers = #tpu.dot_dimension_numbers<[2], [2], [1], [1], [0, 0, 0, 1, 1, 1], [0], [0]>} : vector<1x8x32xf32>, vector<1x8x32xf32>, vector<1x8x8xf32> -> vector<1x8x8xf32>
    %cst_7 = arith.constant dense<0.000000e+00> : vector<1x8x32xf32>
    %14 = tpu.matmul %13, %12, %cst_7 {dimension_numbers = #tpu.dot_dimension_numbers<[2], [1], [1], [2], [0, 0, 0, 1, 1, 2], [0], [0]>} : vector<1x8x8xf32>, vector<1x8x32xf32>, vector<1x8x32xf32> -> vector<1x8x32xf32>
    %cst_8 = arith.constant dense<0xFF800000> : vector<1x8xf32>
    %15 = vector.multi_reduction <maximumf>, %14, %cst_8 [2] : vector<1x8x32xf32> to vector<1x8xf32>
    %16 = vector.shape_cast %15 : vector<1x8xf32> to vector<1x8x1xf32>
    %17 = vector.broadcast %16 : vector<1x8x1xf32> to vector<1x8x32xf32>
    %18 = arith.subf %14, %17 : vector<1x8x32xf32>
    %19 = math.exp %18 : vector<1x8x32xf32>
    %cst_9 = arith.constant dense<0.000000e+00> : vector<1x8xf32>
    %20 = vector.multi_reduction <add>, %19, %cst_9 [2] : vector<1x8x32xf32> to vector<1x8xf32>
    %21 = vector.shape_cast %20 : vector<1x8xf32> to vector<1x8x1xf32>
    %22 = vector.broadcast %21 : vector<1x8x1xf32> to vector<1x8x32xf32>
    %23 = arith.divf %19, %22 : vector<1x8x32xf32>
    %24 = arith.addf %23, %0 : vector<1x8x32xf32>
    %c0_10 = arith.constant 0 : index
    %c0_11 = arith.constant 0 : index
    %c0_12 = arith.constant 0 : index
    %25 = vector.load %arg4[%c0_10, %c0_11, %c0_12] : memref<1x8x32xf32, #tpu.memory_space<vmem>>, vector<1x8x32xf32>
    tpu.vector_store %arg4[%c0_10, %c0_11, %c0_12], %24 {strides = array<i32>} : memref<1x8x32xf32, #tpu.memory_space<vmem>>, vector<1x8x32xf32>,
    return
  }
  func.func @transform_0(%arg0: i32) -> (i32, i32, i32) {
    %c0_i32 = arith.constant 0 : i32
    %c0_i32_0 = arith.constant 0 : i32
    %c0_i32_1 = arith.constant 0 : i32
    return %arg0, %c0_i32, %c0_i32_0 : i32, i32, i32
  }
  func.func @transform_1(%arg0: i32) -> (i32, i32) {
    %c0_i32 = arith.constant 0 : i32
    %c0_i32_0 = arith.constant 0 : i32
    %c0_i32_1 = arith.constant 0 : i32
    return %c0_i32, %c0_i32_0 : i32, i32
  }
  func.func @transform_2(%arg0: i32) -> (i32, i32) {
    %c0_i32 = arith.constant 0 : i32
    %c0_i32_0 = arith.constant 0 : i32
    %c0_i32_1 = arith.constant 0 : i32
    return %c0_i32, %c0_i32_0 : i32, i32
  }
  func.func @transform_3(%arg0: i32) -> (i32, i32, i32) {
    %c0_i32 = arith.constant 0 : i32
    %c0_i32_0 = arith.constant 0 : i32
    %c0_i32_1 = arith.constant 0 : i32
    return %arg0, %c0_i32, %c0_i32_0 : i32, i32, i32
  }
}

</mosaic_0001>

<bundles_post_ra>
// kernel: tpu_custom_call.1
= control target key start
LH: loop header
LB: loop body
LE: loop exit
PB: predicated region body
PF: predicated region fallthrough
CT: control target
= control target key end

     0   :  { %8 = vsyncpa [#allocation3], 0  ;;  %s913_s0 = inlined_call_operand.hbm [shape: f32[2,8,32], index: 0, kind: input, shape index: {}, may-alias: {0,3}]   ;;  %s914_s1 = inlined_call_operand.vmem [shape: f32[32,96], index: 1, kind: input, shape index: {}]   ;;  %s915_s2 = inlined_call_operand.vmem [shape: f32[1,96], index: 2, kind: input, shape index: {}]   ;;  %s916_s3 = inlined_call_operand.hbm [shape: f32[2,8,32], index: 3, kind: output, shape index: {}, may-alias: {0,3}]  }
   0x1   :  { %10 = vsyncpa [#allocation3 + $0x1], 0 }
   0x2   :  { %11 = vsyncpa [#allocation4], 0 }
   0x3   :  { %13 = vsyncpa [#allocation4 + $0x1], 0  ;;  %s744_s12 = smov 0   ;;  %s746_s13 = smov 0  }
   0x4   :  { %s748_s14 = smov 0   ;;  %s750_s15 = smov 0  }
   0x5 LB: > { %s765_s16 = sadd.s32 4294967295, %s716_s15   ;;  %s523_s17 = sadd.s32 4294967294, %s716_s15   ;;  %s716_s15 = sphi %s750_s15, %s933_s15   ;;  %s712_s14 = sphi %s748_s14, %s932_s14   ;;  %s708_s13 = sphi %s746_s13, %s931_s13   ;;  %s704_s12 = sphi %s744_s12, %s930_s12  }
   0x6   : > { %s769_s18 = sadd.s32 1, %s716_s15   ;;  %s26_s19 = sadd.s32 1, %s712_s14 }
   0x7   : > { %s23_s20 = ssub.s32 %s716_s15, %s769_s18  ;;  %p33_p0 = scmp.ne.s32.totalorder %s712_s14, %s708_s13 }
   0x8   : > { %p24_p1 = scmp.eq.s32.totalorder %s23_s20, 0  ;;  %p34_p2 = scmp.eq.s32.totalorder %s716_s15, 0 }
   0x9   : > { %p39_p3 = scmp.ne.s32.totalorder %s708_s13, %s704_s12  ;;  %p40_p4 = scmp.eq.s32.totalorder %s765_s16, 0 }
   0xa   : > { %s781_s21 = scalar_select %p24_p1, %s712_s14, %s26_s19  }
   0xb   : > { %p783_p5 = por %p34_p2, %p33_p0  ;;  %p787_p6 = por %p40_p4, %p39_p3 }
   0xc   : > { %p105_p7 = scmp.eq.s32.totalorder %s765_s16, 1  ;;  %p111_p8 = scmp.eq.s32.totalorder %s523_s17, 1 }
   0xd   : > { %s920_s23 = scalar_select %p787_p6, 1, 0 }
   0xe   : > { %p582_p10 = scmp.lt.s32.totalorder %s716_s15, 2  ;;  %p794_p11 = por %p105_p7, %p33_p0 }
   0xf   : > { %p798_p12 = por %p111_p8, %p39_p3  ;;  %s137_s26 = sand.u32 1, %s712_s14  }
  0x10   : > { %s921_s24 = scalar_select %p794_p11, 1, 0 }
  0x11   : > { %s922_s25 = scalar_select %p798_p12, 1, 0 }
  0x12   : > { %s527_s27 = sshll.u32 %s716_s15, 7  ;;  %s526_s28 = sshll.u32 %s137_s26, 3 }
  0x13   : > { %s807_s4 = scalar_lea.hbm %s913_s0, %s527_s27  ;;  %s141_s5 = scalar_lea.vmem [#allocation2], %s526_s28 }
  0x14   : > { %s148_s6 = sshll.u32 %s141_s5, 4  ;;  %p811_p13 = pnand %p582_p10, %p783_p5  ;;  %s815_s6 = int_to_ptr.vmem [resolvable:$true] %s148_s6 }
  0x15   : > { %s138_s8 = scalar_lea.sflag [#allocation3], %s137_s26  ;;  %s624_s9 = scalar_lea.hbm %s807_s4, 128 }
  0x16   : > { %p625_p2 = scmp.ne.s32.totalorder %s807_s4, %s624_s9  ;;  %p626_p3 = pneg %p811_p13 }
  0x17   : > { %s629_s17 = scalar_lea.hbm %s913_s0, 256  ;;  %p630_p5 = scmp.lt.s32.totalorder %s807_s4, %s913_s0 }
  0x18   : > { %p627_p4 = pnand %p626_p3, %p625_p2  ;;  %p631_p8 = scmp.lt.s32.totalorder %s629_s17, %s624_s9 }
  0x1a   : > { %p628_p7 = pneg %p627_p4  ;;  %p632_p10 = por %p631_p8, %p630_p5 }
  0x1c   : > { %p633_p9 = pnand %p632_p10, %p628_p7 }
  0x1e   : > { %636 = shalt.err (!%p633_p9)
}
  0x1f   : > { %s637_s22 = scalar_lea.vmem %s815_s6, 128  ;;  %s718_s26 = smov [#allocation2]  }
  0x20   : > { %p638_p0 = scmp.ne.s32.totalorder %s815_s6, %s637_s22  ;;  %s642_s27 = sshll.u32 %s718_s26, 4  ;;  %s643_s27 = int_to_ptr.vmem [resolvable:$false] %s642_s27 }
  0x21   : > { %s644_s28 = scalar_lea.vmem %s643_s27, 256  ;;  %p645_p4 = scmp.lt.s32.totalorder %s815_s6, %s643_s27 }
  0x22   : > { %p640_p1 = pnand %p638_p0, %p626_p3  ;;  %p646_p12 = scmp.lt.s32.totalorder %s644_s28, %s637_s22 }
  0x24   : > { %p641_p2 = pneg %p640_p1  ;;  %p647_p11 = por %p646_p12, %p645_p4 }
  0x26   : > { %p648_p6 = pnand %p647_p11, %p641_p2 }
  0x28   : > { %651 = shalt.err (!%p648_p6)
}
  0x29   : > { %577 = dma.hbm_to_vmem [thread:$0]  (!%p811_p13), %s807_s4, 128, %s815_s6, %s138_s8  }
  0x2a   : > { %p924_p9 = scmp.lt.s32.totalorder %s716_s15, 3  ;;  %p925_p7 = scmp.ge.s32.totalorder %s716_s15, 1 }
  0x2c   : > { %p154_p0 = pnand %p925_p7, %p924_p9 }
  0x2d   : > { %s842_s29 = sand.u32 (!%p154_p0), 1, %s708_s13   ;;  %p926_p6 = scmp.ne.s32.totalorder (!%p154_p0), %s920_s23, 0 }
  0x2e   : > { %157 = sbr.rel (%p154_p0) target bundleno = 1088 (0x440), region = 32  ;;  %s529_s30 = sshll.u32 (!%p154_p0), %s842_s29, 3 }
  0x2f   : > { %s160_s5 = scalar_lea.sflag (!%p154_p0), [#allocation3], %s842_s29  ;;  %s163_s7 = scalar_lea.vmem (!%p154_p0), [#allocation2], %s529_s30 }
  0x33   : > { %695 = dma.done.wait (%p926_p6), %s160_s5, 128  }
  0x34   : > { %697 = vsyncadd (%p926_p6), %s160_s5, 4294967168  ;;  %v719_v0 = vmov 0.0   ;;  %vm720_vm0 = vmmov 0   ;;  %v190_v1 = vld [vmem:[%s914_s1 + $0x18] sm:$0xff]  ;;  %v189_v2 = vld [vmem:[%s914_s1 + $0x10] sm:$0xff]  ;;  %vm198_vm1 = vcmask 261120  }
  0x35   : > { %549 = vmatprep.subr.mxu0 %v719_v0  ;;  %557 = vmatprep.mubr.msk.f32.mxu0 %vm720_vm0, %v719_v0  ;;  %v188_v3 = vld [vmem:[%s914_s1 + $0x8] sm:$0xff]  ;;  %v187_v4 = vld [vmem:[%s914_s1] sm:$0xff]  ;;  %s721_s22 = smov 96   ;;  %s722_s26 = smov 64   ;;  %vm352_vm2 = vcmask 64512  }
  0x36   : > { %560 = vmatprep.subr.mxu1 %v719_v0  ;;  %562 = vmatprep.mubr.msk.f32.mxu1 %vm720_vm0, %v719_v0  ;;  %v186_v5 = vld [vmem:[%s163_s7] sm:$0xff]  ;;  %s537_s27 = sshll.u32 %s765_s16, 7  ;;  %s185_s28 = scalar_lea.vmem [#allocation5], %s529_s30 }
  0x37   : > { %550 = vmatpush3.msra.mxu0 %v190_v1  ;;  %v531_v6 = vld [vmem:[%s915_s2] ss:$0 sm:$0xff]  ;;  %s453_s5 = sshll.u32 %s185_s28, 4  ;;  %s451_s6 = scalar_lea.hbm %s916_s3, %s537_s27  ;;  %s454_s5 = int_to_ptr.vmem [resolvable:$true] %s453_s5 }
  0x38   : > { %551 = vmatprep.subr.mxu0 %v719_v0  ;;  %s440_s8 = scalar_lea.sflag [#allocation4], %s842_s29  ;;  %s652_s9 = scalar_lea.vmem %s454_s5, 128 }
  0x39   : > { %552 = vmatpush3.msra.mxu0 %v189_v2  ;;  %p653_p11 = scmp.ne.s32.totalorder %s454_s5, %s652_s9  ;;  %p927_p12 = scmp.ne.s32.totalorder %s921_s24, 0 }
  0x3a   : > { %553 = vmatprep.subr.mxu0 %v719_v0  ;;  %s723_s23 = smov [#allocation5]  }
  0x3b   : > { %554 = vmatpush3.msra.mxu0 %v188_v3  ;;  %p654_p13 = pnand %p653_p11, %p927_p12  ;;  %s656_s16 = sshll.u32 %s723_s23, 4  ;;  %s657_s16 = int_to_ptr.vmem [resolvable:$false] %s656_s16 }
  0x3c   : > { %555 = vmatprep.subr.mxu0 %v719_v0  ;;  %s658_s30 = scalar_lea.vmem %s657_s16, 256  ;;  %p659_p3 = scmp.lt.s32.totalorder %s454_s5, %s657_s16 }
  0x3d   : > { %556 = vmatpush3.msra.mxu0 %v187_v4  ;;  %p655_p1 = pneg %p654_p13  ;;  %p660_p5 = scmp.lt.s32.totalorder %s658_s30, %s652_s9 }
  0x3e   : > { %558 = vmatmul.mubr.msk.f32.vlgmr.msra.gmra.mxu0 %vm198_vm1, %v186_v5 }
  0x3f   : > { %p661_p8 = por %p660_p5, %p659_p3 }
  0x41   : > { %p662_p10 = pnand %p661_p8, %p655_p1 }
  0xfe   : > { %v268_v7 = vpop.f32.mrf.mxu0 }
  0xff   : > { %v269_v8 = vadd.f32 %v531_v6, %v268_v7 }
 0x100   : > { %v559_v9 = vpop.f32.mrf.mxu0 }
 0x101   : > { %273 = vrot.lane.b32.xlu0 %v269_v8, %s721_s22 }
 0x105   : > { %349 = vrot.lane.b32.xlu0 %v269_v8, %s722_s26 }
 0x173   : > { %v274_v10 = vpop.permute.xlu0 %273 }
 0x174   : > { %561 = vmatpush3.xpose.msk.msra.mxu1 %vm198_vm1, %v274_v10 }
 0x175   : > { %565 = vmatprep.subr.mxu1 %v719_v0 }
 0x177   : > { %563 = vmatmul.mubr.msk.f32.vlgmr.msra.gmra.mxu1 %vm198_vm1, %v269_v8  ;;  %v350_v11 = vpop.permute.xlu0 %349 }
 0x178   : > { %566 = vmatpush3.msra.mxu1 %v350_v11  ;;  %567 = vmatprep.mubr.msk.f32.mxu1 %vm720_vm0, %v719_v0 }
 0x237   : > { %v345_v12 = vpop.f32.mrf.mxu1 }
 0x238   : > { %568 = vmatmul.mubr.msk.f32.vlgmr.msra.gmra.mxu1 %vm352_vm2, %v345_v12 }
 0x239   : > { %v564_v13 = vpop.f32.mrf.mxu1 }
 0x2f8   : > { %v422_v14 = vpop.f32.mrf.mxu1 }
 0x2f9   : > { %v426_v15 = vsel %vm198_vm1, %v422_v14, -inf }
 0x2fa   : > { %427 = vmax.xlane.f32.xlu1 %v426_v15  ;;  %v569_v16 = vpop.f32.mrf.mxu1 }
 0x383   : > { %v428_v17 = vpop.xlane.xlu1 %427 }
 0x384   : > { %v429_v18 = vsub.f32 %v422_v14, %v428_v17 }
 0x386   : > { %v430_v19 = vmul.f32 1.442695, %v429_v18 }
 0x388   : > { %620 = vpow2.f32 %v430_v19 }
 0x395   : > { %v621_v20 = vpop.eup %620 }
 0x396   : > { %v432_v21 = vsel %vm198_vm1, %v621_v20, 0.0 }
 0x397   : > { %433 = vadd.xlane.f32.xlu1 %v432_v21 }
 0x420   : > { %v434_v22 = vpop.xlane.xlu1 %433 }
 0x421   : > { %622 = vrcp.f32 %v434_v22 }
 0x42e   : > { %v623_v23 = vpop.eup %622 }
 0x42f   : > { %v436_v24 = vmul.f32 %v623_v23, %v621_v20 }
 0x431   : > { %v437_v25 = vadd.f32 %v436_v24, %v186_v5 }
 0x433   : > { %438 = vst.msk [vmem:[%s185_s28] sm:$0xff] %vm198_vm1, %v437_v25 }
 0x434   : > { %665 = shalt.err (!%p662_p10)
}
 0x435   : > { %s666_s10 = scalar_lea.hbm %s451_s6, 128  ;;  %s670_s17 = scalar_lea.hbm %s916_s3, 256 }
 0x436   : > { %p667_p2 = scmp.ne.s32.totalorder %s451_s6, %s666_s10  ;;  %p671_p7 = scmp.lt.s32.totalorder %s451_s6, %s916_s3 }
 0x437   : > { %p672_p0 = scmp.lt.s32.totalorder %s670_s17, %s666_s10 }
 0x438   : > { %p668_p4 = pnand %p667_p2, %p927_p12 }
 0x439   : > { %p673_p6 = por %p672_p0, %p671_p7 }
 0x43a   : > { %p669_p9 = pneg %p668_p4 }
 0x43c   : > { %p674_p11 = pnand %p673_p6, %p669_p9 }
 0x43e   : > { %677 = shalt.err (!%p674_p11)
}
 0x43f   : > { %572 = dma.vmem_to_hbm [thread:$0]  (%p927_p12), %s454_s5, 128, %s451_s6, %s440_s8  }
 0x440 PF: > { %s465_s22 = sand.u32 1, %s704_s12   ;;  %p928_p13 = scmp.ne.s32.totalorder %s922_s25, 0 }
 0x441   : > { %p929_p1 = scmp.ge.s32.totalorder %s716_s15, 2  ;;  %s466_s26 = scalar_lea.sflag [#allocation4], %s465_s22 }
 0x443   : > { %p579_p3 = pnand %p929_p1, %p928_p13 }
 0x445   : > { %p580_p5 = pneg %p579_p3 }
 0x447   : > { %699 = dma.done.wait (%p580_p5), %s466_s26, 128  }
 0x448   : > { %701 = vsyncadd (%p580_p5), %s466_s26, 4294967168  ;;  %p16_p8 = scmp.ge.s32.totalorder %s769_s18, 4   ;;  %s930_s12 = smov %s708_s13 }
 0x449   : > { %s931_s13 = smov %s712_s14  ;;  %s932_s14 = smov %s781_s21 }
 0x44a   : > { %s933_s15 = smov %s769_s18  ;;  %18 = sbr.rel (!%p16_p8) target bundleno = 5 (0x5), region = 77 }
 0x44f   :  { %471 = vsyncpa [#allocation3], 1 }
 0x450   :  { %473 = vsyncpa [#allocation3 + $0x1], 1 }
 0x451   :  { %474 = vsyncpa [#allocation4], 1 }
 0x452   :  { %476 = vsyncpa [#allocation4 + $0x1], 1 }

</bundles_post_ra>
